<compile_context>
chip_gen: v5e
topology: v5e:2x2
jax: 0.10.0
libtpu: 0.0.40
codegen_flags: <defaults>
</compile_context>

<pallas_src>
import math

import jax
import jax.numpy as jnp
from jax.experimental import pallas as pl
from jax.experimental.pallas import tpu as pltpu


def _round_up(x, m):
    return ((x + m - 1) // m) * m


def residual_block_kernel(pT_ref, w1_ref, t1_ref, w2_ref, t2_ref, o_ref):
    # conv1 as GEMM (bias + BN1 folded into w1'/t1'), then ReLU.
    # (C_pad, CK_pad) @ (CK_pad, row_tile) -> (C_pad, row_tile), f32 accumulate.
    h = jnp.dot(w1_ref[...], pT_ref[...], preferred_element_type=jnp.float32)
    h = jnp.maximum(h + t1_ref[...], 0.0)
    # 1x1 conv2 as GEMM (bias + BN2 folded into w2'/t2'), then ReLU.
    y = jnp.dot(w2_ref[...], h.astype(w2_ref.dtype),
                preferred_element_type=jnp.float32)
    y = jnp.maximum(y + t2_ref[...], 0.0)
    o_ref[...] = y.astype(o_ref.dtype)


def residual_block_forward(x, params, *, kernel_size, stride, eps=1e-5,
                           compute_dtype=jnp.bfloat16,
                           out_dtype=jnp.bfloat16,
                           max_row_tile=4096,
                           vmem_tile_budget_bytes=24 * 1024 * 1024):
    """x: (N, C_in, L_in) float32 (PyTorch NCL). Returns (N, C_out, L_out) f32."""
    w1, b1, w2, b2 = params["w1"], params["b1"], params["w2"], params["b2"]
    g1, be1, m1, v1 = params["bn1"]
    g2, be2, m2, v2 = params["bn2"]

    N, C_in, L_in = x.shape
    C_out = w1.shape[0]
    K = kernel_size
    L_out = (L_in - K) // stride + 1
    M = N * L_out                      # time axis -> lanes
    CK = C_in * K

    # Sublane-only padding (no 128-channel padding: M/time sits on lanes).
    CK_pad = _round_up(CK, 8)
    C_pad = _round_up(C_out, 8)

    in_bytes = jnp.dtype(compute_dtype).itemsize
    out_bytes = jnp.dtype(out_dtype).itemsize

    # ---- lane (row) tile: multiple of 128, bounded by the VMEM budget, and
    # capped so the grid has >= 2 steps when possible (v7x has 2 TCs). ----
    per_col_bytes = 2 * (CK_pad * in_bytes + C_pad * out_bytes)  # dbl-buffered in+out
    rows_by_vmem = max(128, (vmem_tile_budget_bytes // per_col_bytes) // 128 * 128)
    two_core_cap = max(128, _round_up(-(-M // 2), 128))
    row_tile = int(min(max_row_tile, rows_by_vmem, two_core_cap))
    row_tile = max(128, (row_tile // 128) * 128)
    M_pad = _round_up(M, row_tile)

    # ---- glue: im2col gather, built directly transposed (M on the lane axis)
    # P^T[c*K + k, n*L_out + t] = x[n, c, t*stride + k]
    idx = jnp.arange(K)[:, None] + jnp.arange(L_out)[None, :] * stride   # (K, L_out)
    pT = jnp.transpose(x[:, :, idx], (1, 2, 0, 3)).reshape(CK, M)        # (CK, M)

    if (CK_pad, M_pad) == (CK, M):
        pT_p = pT.astype(compute_dtype)
    else:
        pT_p = jnp.zeros((CK_pad, M_pad), compute_dtype)
        pT_p = pT_p.at[:CK, :M].set(pT.astype(compute_dtype))

    # ---- fold eval-mode BatchNorm + conv bias into weights / one shift ----
    s1 = g1 / jnp.sqrt(v1 + eps)
    t1 = s1 * (b1 - m1) + be1
    s2 = g2 / jnp.sqrt(v2 + eps)
    t2 = s2 * (b2 - m2) + be2

    w1_mat = w1.reshape(C_out, CK) * s1[:, None]        # (C_out, CK)
    w2_mat = w2.reshape(C_out, C_out) * s2[:, None]     # (C_out, C_out)

    # Zero padding rows/cols contribute exactly 0; padded output channels are
    # sliced off below.
    w1_p = jnp.zeros((C_pad, CK_pad), jnp.float32).at[:C_out, :CK].set(w1_mat)
    w2_p = jnp.zeros((C_pad, C_pad), jnp.float32).at[:C_out, :C_out].set(w2_mat)
    t1_p = jnp.zeros((C_pad, 1), jnp.float32).at[:C_out, 0].set(t1)
    t2_p = jnp.zeros((C_pad, 1), jnp.float32).at[:C_out, 0].set(t2)

    w1_c = w1_p.astype(compute_dtype)
    w2_c = w2_p.astype(compute_dtype)

    grid = (M_pad // row_tile,)

    # VMEM working set: double-buffered streaming tiles + resident weights.
    # Clamped to 48 MiB so it always fits v7x's 64 MiB physical VMEM.
    tile_vmem = (row_tile * per_col_bytes
                 + 2 * (C_pad * CK_pad + C_pad * C_pad) * in_bytes
                 + 2 * 2 * C_pad * 4)
    vmem_limit = int(min(48 * 1024 * 1024,
                         max(16 * 1024 * 1024, tile_vmem + (4 << 20))))

    flops = 2 * M_pad * CK_pad * C_pad + 2 * M_pad * C_pad * C_pad
    bytes_accessed = (pT_p.size * in_bytes
                      + w1_c.size * in_bytes + w2_c.size * in_bytes
                      + (t1_p.size + t2_p.size) * 4
                      + M_pad * C_pad * out_bytes)

    out_t = pl.pallas_call(
        residual_block_kernel,
        out_shape=jax.ShapeDtypeStruct((C_pad, M_pad), out_dtype),
        grid_spec=pltpu.PrefetchScalarGridSpec(
            num_scalar_prefetch=0,
            grid=grid,
            in_specs=[
                pl.BlockSpec((CK_pad, row_tile), lambda i: (0, i)),  # patches^T (streamed)
                pl.BlockSpec((C_pad, CK_pad), lambda i: (0, 0)),     # folded w1 (resident)
                pl.BlockSpec((C_pad, 1), lambda i: (0, 0)),          # folded shift 1 (f32)
                pl.BlockSpec((C_pad, C_pad), lambda i: (0, 0)),      # folded w2 (resident)
                pl.BlockSpec((C_pad, 1), lambda i: (0, 0)),          # folded shift 2 (f32)
            ],
            out_specs=pl.BlockSpec((C_pad, row_tile), lambda i: (0, i)),
        ),
        compiler_params=pltpu.CompilerParams(
            dimension_semantics=("parallel",),
            vmem_limit_bytes=vmem_limit,
        ),
        cost_estimate=pl.CostEstimate(
            flops=int(flops), transcendentals=0,
            bytes_accessed=int(bytes_accessed)),
    )(pT_p, w1_c, t1_p, w2_c, t2_p)

    out = out_t[:C_out, :M].astype(jnp.float32)   # drop channel / lane padding
    out = out.reshape(C_out, N, L_out)            # columns were ordered (n, t)
    return jnp.transpose(out, (1, 0, 2))          # (N, C_out, L_out)


def reference_forward(x, params, *, kernel_size, stride, eps=1e-5):
    """Pure-JAX reference mirroring the PyTorch forward (eval-mode BN)."""
    w1, b1, w2, b2 = params["w1"], params["b1"], params["w2"], params["b2"]
    g1, be1, m1, v1 = params["bn1"]
    g2, be2, m2, v2 = params["bn2"]
    dn = ("NCH", "OIH", "NCH")

    h = jax.lax.conv_general_dilated(x, w1, (stride,), "VALID", dimension_numbers=dn)
    h = h + b1[None, :, None]
    h = g1[None, :, None] * (h - m1[None, :, None]) / jnp.sqrt(v1[None, :, None] + eps) \
        + be1[None, :, None]
    h = jnp.maximum(h, 0.0)
    y = jax.lax.conv_general_dilated(h, w2, (1,), "VALID", dimension_numbers=dn)
    y = y + b2[None, :, None]
    y = g2[None, :, None] * (y - m2[None, :, None]) / jnp.sqrt(v2[None, :, None] + eps) \
        + be2[None, :, None]
    return jnp.maximum(y, 0.0)


if __name__ == "__main__":
    # small shapes consistent with the module (Conv1d, stride=3 default)
    N, C_in, C_out = 2, 4, 8
    K, stride, L_in = 4, 3, 49
    L_out = (L_in - K) // stride + 1

    key = jax.random.PRNGKey(0)
    kx, k1, k2, k3, k4 = jax.random.split(key, 5)

    x = jax.random.normal(kx, (N, C_in, L_in), dtype=jnp.float32)

    # deterministic parameter init mirroring the module's __init__/init_weights
    w1 = 0.01 * jax.random.normal(k1, (C_out, C_in, K), dtype=jnp.float32)
    b1 = jax.random.uniform(k2, (C_out,), jnp.float32,
                            -1.0 / math.sqrt(C_in * K), 1.0 / math.sqrt(C_in * K))
    w2 = 0.01 * jax.random.normal(k3, (C_out, C_out, 1), dtype=jnp.float32)
    b2 = jax.random.uniform(k4, (C_out,), jnp.float32,
                            -1.0 / math.sqrt(C_out), 1.0 / math.sqrt(C_out))

    ones = jnp.ones((C_out,), jnp.float32)
    zeros = jnp.zeros((C_out,), jnp.float32)
    params = {
        "w1": w1, "b1": b1, "w2": w2, "b2": b2,
        "bn1": (ones, zeros, zeros, ones),   # gamma, beta, running_mean, running_var
        "bn2": (ones, zeros, zeros, ones),
    }

    ref = jax.block_until_ready(
        reference_forward(x, params, kernel_size=K, stride=stride))

    # 1) f32 compute + f32 output: bit-tight check of the fused/folded math.
    out_f32 = jax.block_until_ready(
        residual_block_forward(x, params, kernel_size=K, stride=stride,
                               compute_dtype=jnp.float32,
                               out_dtype=jnp.float32))
    assert out_f32.shape == (N, C_out, L_out), out_f32.shape
    assert jnp.allclose(out_f32, ref, atol=1e-5, rtol=1e-5), \
        float(jnp.max(jnp.abs(out_f32 - ref)))

    # 2) default bf16 GEMM + bf16 output path (MXU fast path, halved writeback),
    #    f32 accumulate + f32 epilogue: bf16-level tolerance vs. f32 reference.
    out_bf16 = jax.block_until_ready(
        residual_block_forward(x, params, kernel_size=K, stride=stride))
    assert out_bf16.shape == (N, C_out, L_out), out_bf16.shape
    assert jnp.allclose(out_bf16, ref, atol=3e-2, rtol=3e-2), \
        float(jnp.max(jnp.abs(out_bf16 - ref)))

    print("KERNEL_OK")
</pallas_src>

<mosaic_0001>
module attributes {stable_mosaic.version = 11 : i64} {
  func.func @residual_block_kernel(%arg0: i32, %arg1: memref<16x128xf32, #tpu.memory_space<vmem>>, %arg2: memref<8x16xf32, #tpu.memory_space<vmem>>, %arg3: memref<8x1xf32, #tpu.memory_space<vmem>>, %arg4: memref<8x8xf32, #tpu.memory_space<vmem>>, %arg5: memref<8x1xf32, #tpu.memory_space<vmem>>, %arg6: memref<8x128xf32, #tpu.memory_space<vmem>>) attributes {dimension_semantics = [#tpu.dimension_semantics<parallel>], iteration_bounds = array<i64: 1>, scalar_prefetch = 0 : i64, scratch_operands = 0 : i64, tpu.core_type = #tpu.core_type<tc>, window_params = [{transform_indices = @transform_0, window_bounds = array<i64: 16, 128>}, {pipeline_mode = #tpu.pipeline_mode<synchronous>, transform_indices = @transform_1, window_bounds = array<i64: 8, 16>}, {pipeline_mode = #tpu.pipeline_mode<synchronous>, transform_indices = @transform_2, window_bounds = array<i64: 8, 1>}, {pipeline_mode = #tpu.pipeline_mode<synchronous>, transform_indices = @transform_3, window_bounds = array<i64: 8, 8>}, {pipeline_mode = #tpu.pipeline_mode<synchronous>, transform_indices = @transform_4, window_bounds = array<i64: 8, 1>}, {transform_indices = @transform_5, window_bounds = array<i64: 8, 128>}]} {
    %c0 = arith.constant 0 : index
    %c0_0 = arith.constant 0 : index
    %0 = vector.load %arg2[%c0, %c0_0] : memref<8x16xf32, #tpu.memory_space<vmem>>, vector<8x16xf32>
    %c0_1 = arith.constant 0 : index
    %c0_2 = arith.constant 0 : index
    %1 = vector.load %arg1[%c0_1, %c0_2] : memref<16x128xf32, #tpu.memory_space<vmem>>, vector<16x128xf32>
    %cst = arith.constant dense<0.000000e+00> : vector<8x128xf32>
    %2 = tpu.matmul %0, %1, %cst {dimension_numbers = #tpu.dot_dimension_numbers<[1], [0], [0], [1], [0, 0, 1, 1], [], []>} : vector<8x16xf32>, vector<16x128xf32>, vector<8x128xf32> -> vector<8x128xf32>
    %c0_3 = arith.constant 0 : index
    %c0_4 = arith.constant 0 : index
    %3 = vector.load %arg3[%c0_3, %c0_4] : memref<8x1xf32, #tpu.memory_space<vmem>>, vector<8x1xf32>
    %4 = vector.broadcast %3 : vector<8x1xf32> to vector<8x128xf32>
    %5 = arith.addf %2, %4 : vector<8x128xf32>
    %cst_5 = arith.constant 0.000000e+00 : f32
    %6 = vector.broadcast %cst_5 : f32 to vector<8x128xf32>
    %7 = arith.maximumf %5, %6 : vector<8x128xf32>
    %c0_6 = arith.constant 0 : index
    %c0_7 = arith.constant 0 : index
    %8 = vector.load %arg4[%c0_6, %c0_7] : memref<8x8xf32, #tpu.memory_space<vmem>>, vector<8x8xf32>
    %cst_8 = arith.constant dense<0.000000e+00> : vector<8x128xf32>
    %9 = tpu.matmul %8, %7, %cst_8 {dimension_numbers = #tpu.dot_dimension_numbers<[1], [0], [0], [1], [0, 0, 1, 1], [], []>} : vector<8x8xf32>, vector<8x128xf32>, vector<8x128xf32> -> vector<8x128xf32>
    %c0_9 = arith.constant 0 : index
    %c0_10 = arith.constant 0 : index
    %10 = vector.load %arg5[%c0_9, %c0_10] : memref<8x1xf32, #tpu.memory_space<vmem>>, vector<8x1xf32>
    %11 = vector.broadcast %10 : vector<8x1xf32> to vector<8x128xf32>
    %12 = arith.addf %9, %11 : vector<8x128xf32>
    %cst_11 = arith.constant 0.000000e+00 : f32
    %13 = vector.broadcast %cst_11 : f32 to vector<8x128xf32>
    %14 = arith.maximumf %12, %13 : vector<8x128xf32>
    %c0_12 = arith.constant 0 : index
    %c0_13 = arith.constant 0 : index
    %15 = vector.load %arg6[%c0_12, %c0_13] : memref<8x128xf32, #tpu.memory_space<vmem>>, vector<8x128xf32>
    tpu.vector_store %arg6[%c0_12, %c0_13], %14 {strides = array<i32>} : memref<8x128xf32, #tpu.memory_space<vmem>>, vector<8x128xf32>,
    return
  }
  func.func @transform_0(%arg0: i32) -> (i32, i32) {
    %c0_i32 = arith.constant 0 : i32
    %c0_i32_0 = arith.constant 0 : i32
    return %c0_i32, %arg0 : i32, i32
  }
  func.func @transform_1(%arg0: i32) -> (i32, i32) {
    %c0_i32 = arith.constant 0 : i32
    %c0_i32_0 = arith.constant 0 : i32
    %c0_i32_1 = arith.constant 0 : i32
    return %c0_i32, %c0_i32_0 : i32, i32
  }
  func.func @transform_2(%arg0: i32) -> (i32, i32) {
    %c0_i32 = arith.constant 0 : i32
    %c0_i32_0 = arith.constant 0 : i32
    %c0_i32_1 = arith.constant 0 : i32
    return %c0_i32, %c0_i32_0 : i32, i32
  }
  func.func @transform_3(%arg0: i32) -> (i32, i32) {
    %c0_i32 = arith.constant 0 : i32
    %c0_i32_0 = arith.constant 0 : i32
    %c0_i32_1 = arith.constant 0 : i32
    return %c0_i32, %c0_i32_0 : i32, i32
  }
  func.func @transform_4(%arg0: i32) -> (i32, i32) {
    %c0_i32 = arith.constant 0 : i32
    %c0_i32_0 = arith.constant 0 : i32
    %c0_i32_1 = arith.constant 0 : i32
    return %c0_i32, %c0_i32_0 : i32, i32
  }
  func.func @transform_5(%arg0: i32) -> (i32, i32) {
    %c0_i32 = arith.constant 0 : i32
    %c0_i32_0 = arith.constant 0 : i32
    return %c0_i32, %arg0 : i32, i32
  }
}

</mosaic_0001>

<bundles_post_ra>
// kernel: tpu_custom_call.1
= control target key start
LH: loop header
LB: loop body
LE: loop exit
PB: predicated region body
PF: predicated region fallthrough
CT: control target
= control target key end

     0   :  { %10 = vsyncpa [#allocation3], 0  ;;  %s274_s0 = inlined_call_operand.vmem [shape: f32[16,128], index: 0, kind: input, shape index: {}]   ;;  %s275_s1 = inlined_call_operand.hbm [shape: f32[8,16], index: 1, kind: input, shape index: {}]   ;;  %s276_s2 = inlined_call_operand.vmem [shape: f32[8,1], index: 2, kind: input, shape index: {}]   ;;  %s277_s3 = inlined_call_operand.hbm [shape: f32[8,8], index: 3, kind: input, shape index: {}]   ;;  %s278_s4 = inlined_call_operand.vmem [shape: f32[8,1], index: 4, kind: input, shape index: {}]   ;;  %s279_s5 = inlined_call_operand.hbm [shape: f32[8,128], index: 5, kind: output, shape index: {}]  }
   0x1   :  { %11 = vsyncpa [#allocation6], 0 }
   0x2   :  { %12 = vsyncpa [#allocation4], 0  ;;  %s20_s20 = sshll.u32 %s275_s1, 4  ;;  %s219_s21 = smov [#allocation2]   ;;  %s21_s20 = int_to_ptr.hbm [resolvable:$true] %s20_s20 }
   0x3   :  { %s22_s22 = sshll.u32 %s219_s21, 4  ;;  %s33_s25 = sshll.u32 %s277_s3, 4  ;;  %s23_s22 = int_to_ptr.vmem [resolvable:$true] %s22_s22  ;;  %s34_s25 = int_to_ptr.hbm [resolvable:$true] %s33_s25 }
   0x4   :  { %25 = dma.hbm_to_vmem [thread:$0]  %s21_s20, 128, %s23_s22, [#allocation3]  }
   0x5   :  { %s220_s26 = smov [#allocation5]  }
   0x6   :  { %s35_s27 = sshll.u32 %s220_s26, 4  ;;  %s36_s27 = int_to_ptr.vmem [resolvable:$true] %s35_s27 }
   0x7   :  { %38 = dma.hbm_to_vmem [thread:$0]  %s34_s25, 128, %s36_s27, [#allocation6]  }
   0x8   :  { %213 = dma.done.wait [#allocation3], 128  }
   0x9   :  { %214 = vsyncadd [#allocation3], 4294967168 }
   0xa   :  { %215 = dma.done.wait [#allocation6], 128  }
   0xb   :  { %216 = vsyncadd [#allocation6], 4294967168  ;;  %v221_v0 = vmov 0   ;;  %v51_v1 = vld [vmem:[%s274_s0 + $0x8] sm:$0xff]  ;;  %v50_v2 = vld [vmem:[%s274_s0] sm:$0xff]  ;;  %vm58_vm0 = vcmask 130048  }
   0xc   :  { %140 = vset.pattern.permute.xlu0 %v221_v0  ;;  %76 = vmatpush.msra.mxu0 %v51_v1  ;;  %v49_v3 = vld [vmem:[#allocation2] sm:$0xff]  ;;  %v83_v10 = vld [vmem:[#allocation5] sm:$0xff]  ;;  %vm90_vm1 = vcmask 64512   ;;  %s222_s0 = smov [#allocation7]   ;;  %s123_s11 = sshll.u32 %s279_s5, 4  ;;  %s124_s11 = int_to_ptr.hbm [resolvable:$true] %s123_s11 }
   0xd   :  { %v52_v4 = vld [vmem:[%s276_s2] sm:$0xff]  ;;  %s121_s2 = sshll.u32 %s222_s0, 4  ;;  %s122_s2 = int_to_ptr.vmem [resolvable:$true] %s121_s2 }
   0xe   :  { %55 = vperm.xlu0 %140, %v52_v4   ;;  %77 = vmatpush.msra.mxu0 %v50_v2  ;;  %v84_v5 = vld [vmem:[%s278_s4] sm:$0xff] }
   0xf   :  { %134 = vmatmul.msk.f32.vlgmr.msra.gmra.mxu0 %vm58_vm0, %v49_v3 }
  0x16   :  { %87 = vperm.xlu0 %140, %v84_v5  }
  0x80   :  { %v56_v6 = vpop.permute.xlu0 %55 }
  0x88   :  { %v88_v11 = vpop.permute.xlu0 %87 }
  0x8c   :  { %v79_v7 = vpop.f32.mrf.mxu0 }
  0x8d   :  { %v80_v8 = vadd.f32 %v79_v7, %v56_v6 }
  0x8f   :  { %v82_v9 = vmax.f32 %v80_v8, 0.0 }
  0x91   :  { %109 = vmatpush.msra.mxu1 %v82_v9 }
  0x92   :  { %135 = vmatmul.msk.f32.vlgmr.msra.gmra.mxu1 %vm90_vm1, %v83_v10 }
 0x10f   :  { %v111_v12 = vpop.f32.mrf.mxu1 }
 0x110   :  { %v112_v13 = vadd.f32 %v111_v12, %v88_v11 }
 0x112   :  { %v114_v14 = vmax.f32 %v112_v13, 0.0 }
 0x114   :  { %115 = vst [vmem:[#allocation7] sm:$0xff] %v114_v14 }
 0x115   :  { %126 = dma.vmem_to_hbm [thread:$0]  %s122_s2, 128, %s124_s11, [#allocation4]  }
 0x116   :  { %217 = dma.done.wait [#allocation4], 128  }
 0x117   :  { %218 = vsyncadd [#allocation4], 4294967168 }
 0x118   :  { %131 = vsyncpa [#allocation3], 1 }
 0x119   :  { %132 = vsyncpa [#allocation6], 1 }
 0x11a   :  { %133 = vsyncpa [#allocation4], 1 }

</bundles_post_ra>
